<compile_context>
chip_gen: v7x
topology: tpu7x:2x2x1
jax: 0.10.0
libtpu: 0.0.40
codegen_flags: <defaults>
</compile_context>

<pallas_src>
import jax
import jax.numpy as jnp
from jax.experimental import pallas as pl
from jax.experimental.pallas import tpu as pltpu

K_IN = 784   # input features (unpadded; Mosaic handles K=784 contraction)
N1 = 256     # fc1 out (already a multiple of 128)
N2 = 128     # fc2 out: 64 -> 128 (lane-dense)
N3 = 128     # fc3 out: 10 -> 128 (lane-dense)
MAX_TM = 512 # target batch (M) tile for large batches


def mlp_kernel(x_ref, w1_ref, b1_ref, w2_ref, b2_ref, w3_ref, b3_ref, o_ref):
    # Three MXU matmuls (bf16 operands, f32 accumulation) with VPU bias-add +
    # ReLU fused in between, all on VMEM-resident tiles. The f32->bf16 cast of
    # x rides the VPU as free filler under the MXU.
    x = x_ref[...].astype(jnp.bfloat16)
    h1 = jnp.dot(x, w1_ref[...], preferred_element_type=jnp.float32) + b1_ref[...]
    h1 = jnp.maximum(h1, 0.0).astype(jnp.bfloat16)
    h2 = jnp.dot(h1, w2_ref[...], preferred_element_type=jnp.float32) + b2_ref[...]
    h2 = jnp.maximum(h2, 0.0).astype(jnp.bfloat16)
    out = jnp.dot(h2, w3_ref[...], preferred_element_type=jnp.float32) + b3_ref[...]
    o_ref[...] = out


def _round_up(v, m):
    return ((v + m - 1) // m) * m


def _pad_to(a, shape):
    return jnp.pad(a, [(0, t - s) for s, t in zip(a.shape, shape)])


def prepare_params(w1, b1, w2, b2, w3, b3):
    """One-time weight prep (pad to lane-dense widths, cast matmul operands to
    bf16). Done OUTSIDE the per-call forward so no per-call weight traffic."""
    w1_p = w1.astype(jnp.bfloat16)                        # (784, 256)
    b1_p = b1.astype(jnp.float32)                         # (1, 256)
    w2_p = _pad_to(w2, (N1, N2)).astype(jnp.bfloat16)     # (256, 128)
    b2_p = _pad_to(b2, (1, N2)).astype(jnp.float32)       # (1, 128)
    w3_p = _pad_to(w3, (N2, N3)).astype(jnp.bfloat16)     # (128, 128)
    b3_p = _pad_to(b3, (1, N3)).astype(jnp.float32)       # (1, 128)
    return (w1_p, b1_p, w2_p, b2_p, w3_p, b3_p)


@jax.jit
def mlp_forward(x, params):
    """Net.forward: relu(x@W1+b1) -> relu(@W2+b2) -> @W3+b3.

    x: [B, 784] f32 (unpadded); params: output of prepare_params.
    Returns [B, 10] f32 logits.
    """
    w1_p, b1_p, w2_p, b2_p, w3_p, b3_p = params
    B, K = x.shape

    # Adaptive batch tiling:
    #   * B <= 512: single grid step, TM = round_up(B, 8) -> no 16x row waste
    #     at tiny batches.
    #   * B  > 512: ceil(B/512) steps (>= 2, so v7x's two TCs both get work),
    #     TM ~ B/steps rounded to the 8-row sublane tile; padding waste < 8
    #     rows per step.
    num_steps = max(1, -(-B // MAX_TM))
    tm = _round_up(-(-B // num_steps), 8)
    b_pad = tm * num_steps

    x_p = x if b_pad == B else jnp.pad(x, ((0, b_pad - B), (0, 0)))

    flops = 2 * b_pad * (K * N1 + N1 * N2 + N2 * N3)
    bytes_accessed = (
        b_pad * K * 4                                     # x (f32 in)
        + (w1_p.size + w2_p.size + w3_p.size) * 2         # bf16 weights
        + (b1_p.size + b2_p.size + b3_p.size) * 4         # f32 biases
        + b_pad * N3 * 4                                  # f32 out
    )

    const = lambda i: (0, 0)  # weights/biases stay resident across the batch grid
    out = pl.pallas_call(
        mlp_kernel,
        out_shape=jax.ShapeDtypeStruct((b_pad, N3), jnp.float32),
        grid=(num_steps,),
        in_specs=[
            pl.BlockSpec((tm, K), lambda i: (i, 0)),      # last dim == full dim: legal
            pl.BlockSpec((K, N1), const),
            pl.BlockSpec((1, N1), const),
            pl.BlockSpec((N1, N2), const),
            pl.BlockSpec((1, N2), const),
            pl.BlockSpec((N2, N3), const),
            pl.BlockSpec((1, N3), const),
        ],
        out_specs=pl.BlockSpec((tm, N3), lambda i: (i, 0)),
        compiler_params=pltpu.CompilerParams(
            dimension_semantics=("parallel",)),
        cost_estimate=pl.CostEstimate(
            flops=flops, transcendentals=0, bytes_accessed=bytes_accessed),
    )(x_p, w1_p, b1_p, w2_p, b2_p, w3_p, b3_p)
    return out[:B, :10]


def init_params(key):
    # Deterministic synthetic parameters (shapes match Net.__init__):
    #   fc1: Linear(784, 256), fc2: Linear(256, 64), fc3: Linear(64, 10)
    k1, k2, k3 = jax.random.split(key, 3)

    def linear(k, fan_in, fan_out):
        bound = 1.0 / jnp.sqrt(fan_in)
        kw, kb = jax.random.split(k)
        w = jax.random.uniform(kw, (fan_in, fan_out), jnp.float32, -bound, bound)
        b = jax.random.uniform(kb, (1, fan_out), jnp.float32, -bound, bound)
        return w, b

    w1, b1 = linear(k1, 28 * 28, 256)
    w2, b2 = linear(k2, 256, 64)
    w3, b3 = linear(k3, 64, 10)
    return w1, b1, w2, b2, w3, b3


def reference_forward(x, w1, b1, w2, b2, w3, b3):
    h1 = jnp.maximum(x @ w1 + b1, 0.0)
    h2 = jnp.maximum(h1 @ w2 + b2, 0.0)
    return h2 @ w3 + b3


if __name__ == "__main__":
    key = jax.random.PRNGKey(0)
    kx, kx2, kp = jax.random.split(key, 3)

    params_raw = init_params(kp)
    params = prepare_params(*params_raw)        # one-time weight prep

    # Small-batch path: single grid step, no batch padding (TM = 8).
    batch = 8
    x = jax.random.normal(kx, (batch, 28 * 28), jnp.float32)
    out = jax.block_until_ready(mlp_forward(x, params))
    ref = reference_forward(x, *params_raw)
    assert out.shape == (batch, 10)
    # Loose tolerance accounts for bf16 matmul operands (f32 accumulation).
    assert jnp.allclose(out, ref, atol=7.5e-2, rtol=5e-2)

    # Multi-step path: grid > 1 (exercises batch padding + 2 TC sharding).
    batch_big = 1040
    x_big = jax.random.normal(kx2, (batch_big, 28 * 28), jnp.float32)
    out_big = jax.block_until_ready(mlp_forward(x_big, params))
    ref_big = reference_forward(x_big, *params_raw)
    assert out_big.shape == (batch_big, 10)
    assert jnp.allclose(out_big, ref_big, atol=7.5e-2, rtol=5e-2)

    print("KERNEL_OK")
</pallas_src>

<mosaic_0001>
module attributes {stable_mosaic.version = 11 : i64} {
  func.func @mlp_kernel(%arg0: i32, %arg1: memref<8x784xf32, #tpu.memory_space<vmem>>, %arg2: memref<784x256xbf16, #tpu.memory_space<vmem>>, %arg3: memref<1x256xf32, #tpu.memory_space<vmem>>, %arg4: memref<256x128xbf16, #tpu.memory_space<vmem>>, %arg5: memref<1x128xf32, #tpu.memory_space<vmem>>, %arg6: memref<128x128xbf16, #tpu.memory_space<vmem>>, %arg7: memref<1x128xf32, #tpu.memory_space<vmem>>, %arg8: memref<8x128xf32, #tpu.memory_space<vmem>>) attributes {dimension_semantics = [#tpu.dimension_semantics<parallel>], iteration_bounds = array<i64: 1>, scalar_prefetch = 0 : i64, scratch_operands = 0 : i64, tpu.core_type = #tpu.core_type<tc>, window_params = [{transform_indices = @transform_0, window_bounds = array<i64: 8, 784>}, {pipeline_mode = #tpu.pipeline_mode<synchronous>, transform_indices = @transform_1, window_bounds = array<i64: 784, 256>}, {pipeline_mode = #tpu.pipeline_mode<synchronous>, transform_indices = @transform_2, window_bounds = array<i64: 1, 256>}, {pipeline_mode = #tpu.pipeline_mode<synchronous>, transform_indices = @transform_3, window_bounds = array<i64: 256, 128>}, {pipeline_mode = #tpu.pipeline_mode<synchronous>, transform_indices = @transform_4, window_bounds = array<i64: 1, 128>}, {pipeline_mode = #tpu.pipeline_mode<synchronous>, transform_indices = @transform_5, window_bounds = array<i64: 128, 128>}, {pipeline_mode = #tpu.pipeline_mode<synchronous>, transform_indices = @transform_6, window_bounds = array<i64: 1, 128>}, {transform_indices = @transform_7, window_bounds = array<i64: 8, 128>}]} {
    %c0 = arith.constant 0 : index
    %c0_0 = arith.constant 0 : index
    %0 = vector.load %arg1[%c0, %c0_0] : memref<8x784xf32, #tpu.memory_space<vmem>>, vector<8x784xf32>
    %1 = arith.truncf %0 : vector<8x784xf32> to vector<8x784xbf16>
    %c0_1 = arith.constant 0 : index
    %c0_2 = arith.constant 0 : index
    %2 = vector.load %arg2[%c0_1, %c0_2] : memref<784x256xbf16, #tpu.memory_space<vmem>>, vector<784x256xbf16>
    %cst = arith.constant dense<0.000000e+00> : vector<8x256xf32>
    %3 = tpu.matmul %1, %2, %cst {dimension_numbers = #tpu.dot_dimension_numbers<[1], [0], [0], [1], [0, 0, 1, 1], [], []>} : vector<8x784xbf16>, vector<784x256xbf16>, vector<8x256xf32> -> vector<8x256xf32>
    %c0_3 = arith.constant 0 : index
    %c0_4 = arith.constant 0 : index
    %4 = vector.load %arg3[%c0_3, %c0_4] : memref<1x256xf32, #tpu.memory_space<vmem>>, vector<1x256xf32>
    %5 = vector.broadcast %4 : vector<1x256xf32> to vector<8x256xf32>
    %6 = arith.addf %3, %5 : vector<8x256xf32>
    %cst_5 = arith.constant 0.000000e+00 : f32
    %7 = vector.broadcast %cst_5 : f32 to vector<8x256xf32>
    %8 = arith.maximumf %6, %7 : vector<8x256xf32>
    %9 = arith.truncf %8 : vector<8x256xf32> to vector<8x256xbf16>
    %c0_6 = arith.constant 0 : index
    %c0_7 = arith.constant 0 : index
    %10 = vector.load %arg4[%c0_6, %c0_7] : memref<256x128xbf16, #tpu.memory_space<vmem>>, vector<256x128xbf16>
    %cst_8 = arith.constant dense<0.000000e+00> : vector<8x128xf32>
    %11 = tpu.matmul %9, %10, %cst_8 {dimension_numbers = #tpu.dot_dimension_numbers<[1], [0], [0], [1], [0, 0, 1, 1], [], []>} : vector<8x256xbf16>, vector<256x128xbf16>, vector<8x128xf32> -> vector<8x128xf32>
    %c0_9 = arith.constant 0 : index
    %c0_10 = arith.constant 0 : index
    %12 = vector.load %arg5[%c0_9, %c0_10] : memref<1x128xf32, #tpu.memory_space<vmem>>, vector<1x128xf32>
    %13 = vector.broadcast %12 : vector<1x128xf32> to vector<8x128xf32>
    %14 = arith.addf %11, %13 : vector<8x128xf32>
    %cst_11 = arith.constant 0.000000e+00 : f32
    %15 = vector.broadcast %cst_11 : f32 to vector<8x128xf32>
    %16 = arith.maximumf %14, %15 : vector<8x128xf32>
    %17 = arith.truncf %16 : vector<8x128xf32> to vector<8x128xbf16>
    %c0_12 = arith.constant 0 : index
    %c0_13 = arith.constant 0 : index
    %18 = vector.load %arg6[%c0_12, %c0_13] : memref<128x128xbf16, #tpu.memory_space<vmem>>, vector<128x128xbf16>
    %cst_14 = arith.constant dense<0.000000e+00> : vector<8x128xf32>
    %19 = tpu.matmul %17, %18, %cst_14 {dimension_numbers = #tpu.dot_dimension_numbers<[1], [0], [0], [1], [0, 0, 1, 1], [], []>} : vector<8x128xbf16>, vector<128x128xbf16>, vector<8x128xf32> -> vector<8x128xf32>
    %c0_15 = arith.constant 0 : index
    %c0_16 = arith.constant 0 : index
    %20 = vector.load %arg7[%c0_15, %c0_16] : memref<1x128xf32, #tpu.memory_space<vmem>>, vector<1x128xf32>
    %21 = vector.broadcast %20 : vector<1x128xf32> to vector<8x128xf32>
    %22 = arith.addf %19, %21 : vector<8x128xf32>
    %c0_17 = arith.constant 0 : index
    %c0_18 = arith.constant 0 : index
    %23 = vector.load %arg8[%c0_17, %c0_18] : memref<8x128xf32, #tpu.memory_space<vmem>>, vector<8x128xf32>
    tpu.vector_store %arg8[%c0_17, %c0_18], %22 {strides = array<i32>} : memref<8x128xf32, #tpu.memory_space<vmem>>, vector<8x128xf32>,
    return
  }
  func.func @transform_0(%arg0: i32) -> (i32, i32) {
    %c0_i32 = arith.constant 0 : i32
    %c0_i32_0 = arith.constant 0 : i32
    return %arg0, %c0_i32 : i32, i32
  }
  func.func @transform_1(%arg0: i32) -> (i32, i32) {
    %c0_i32 = arith.constant 0 : i32
    %c0_i32_0 = arith.constant 0 : i32
    %c0_i32_1 = arith.constant 0 : i32
    return %c0_i32, %c0_i32_0 : i32, i32
  }
  func.func @transform_2(%arg0: i32) -> (i32, i32) {
    %c0_i32 = arith.constant 0 : i32
    %c0_i32_0 = arith.constant 0 : i32
    %c0_i32_1 = arith.constant 0 : i32
    return %c0_i32, %c0_i32_0 : i32, i32
  }
  func.func @transform_3(%arg0: i32) -> (i32, i32) {
    %c0_i32 = arith.constant 0 : i32
    %c0_i32_0 = arith.constant 0 : i32
    %c0_i32_1 = arith.constant 0 : i32
    return %c0_i32, %c0_i32_0 : i32, i32
  }
  func.func @transform_4(%arg0: i32) -> (i32, i32) {
    %c0_i32 = arith.constant 0 : i32
    %c0_i32_0 = arith.constant 0 : i32
    %c0_i32_1 = arith.constant 0 : i32
    return %c0_i32, %c0_i32_0 : i32, i32
  }
  func.func @transform_5(%arg0: i32) -> (i32, i32) {
    %c0_i32 = arith.constant 0 : i32
    %c0_i32_0 = arith.constant 0 : i32
    %c0_i32_1 = arith.constant 0 : i32
    return %c0_i32, %c0_i32_0 : i32, i32
  }
  func.func @transform_6(%arg0: i32) -> (i32, i32) {
    %c0_i32 = arith.constant 0 : i32
    %c0_i32_0 = arith.constant 0 : i32
    %c0_i32_1 = arith.constant 0 : i32
    return %c0_i32, %c0_i32_0 : i32, i32
  }
  func.func @transform_7(%arg0: i32) -> (i32, i32) {
    %c0_i32 = arith.constant 0 : i32
    %c0_i32_0 = arith.constant 0 : i32
    return %arg0, %c0_i32 : i32, i32
  }
}

</mosaic_0001>

<bundles_post_ra>
// kernel: mlp_forward.1
= control target key start
LH: loop header
LB: loop body
LE: loop exit
PB: predicated region body
PF: predicated region fallthrough
CT: control target
= control target key end

     0   :  { %12 = vsyncpa [#allocation3], 0  ;;  %s1783_s0 = inlined_call_operand.hbm [shape: f32[8,784], index: 0, kind: input, shape index: {}]   ;;  %s1784_s1 = inlined_call_operand.hbm [shape: bf16[784,256], index: 1, kind: input, shape index: {}]   ;;  %s1785_s2 = inlined_call_operand.vmem [shape: f32[1,256], index: 2, kind: input, shape index: {}]   ;;  %s1786_s3 = inlined_call_operand.hbm [shape: bf16[256,128], index: 3, kind: input, shape index: {}]   ;;  %s1787_s4 = inlined_call_operand.vmem [shape: f32[1,128], index: 4, kind: input, shape index: {}]   ;;  %s1788_s5 = inlined_call_operand.hbm [shape: bf16[128,128], index: 5, kind: input, shape index: {}]   ;;  %s1789_s6 = inlined_call_operand.vmem [shape: f32[1,128], index: 6, kind: input, shape index: {}]   ;;  %s1790_s7 = inlined_call_operand.hbm [shape: f32[8,128], index: 7, kind: output, shape index: {}]  }
   0x1   :  { %13 = vsyncpa [#allocation6], 0 }
   0x2   :  { %14 = vsyncpa [#allocation9], 0 }
   0x3   :  { %15 = vsyncpa [#allocation4], 0  ;;  %s1662_s24 = smov [#allocation5]   ;;  %s1544_s28 = scalar_lea.hbm %s1784_s1, 12544 }
   0x4   :  { %s31_s25 = sshll.u32 %s1662_s24, 4  ;;  %p1545_p0 = scmp.ne.s32.totalorder %s1784_s1, %s1544_s28  ;;  %s32_s25 = int_to_ptr.vmem [resolvable:$true] %s31_s25 }
   0x5   :  { %p1548_p1 = scmp.lt.u32.totalorder %s1544_s28, %s1784_s1 }
   0x7   :  { %p1550_p2 = pnand %p1548_p1, %p1545_p0 }
   0x9   :  { %1553 = shalt.err (!%p1550_p2)
}
   0xa   :  { %s1554_s10 = scalar_lea.vmem %s32_s25, 12544  ;;  %p1559_p4 = scmp.lt.s32.totalorder %s32_s25, %s32_s25 }
   0xb   :  { %p1555_p3 = scmp.ne.s32.totalorder %s32_s25, %s1554_s10  ;;  %p1560_p5 = scmp.lt.s32.totalorder %s1554_s10, %s1554_s10 }
   0xd   :  { %p1561_p6 = por %p1560_p5, %p1559_p4 }
   0xf   :  { %p1562_p7 = pnand %p1561_p6, %p1555_p3 }
  0x11   :  { %1565 = shalt.err (!%p1562_p7)
}
  0x12   :  { %s1663_s11 = smov 128   ;;  %s1664_s12 = smov 8  }
  0x13   :  { %37 = dma.hbm_to_vmem [thread:$0]  %s1784_s1, 12544, %s32_s25, [#allocation6], %s1663_s11, %s1663_s11, %s1664_s12  }
  0x14   :  { %s1665_s15 = smov [#allocation2]   ;;  %s1666_s17 = smov [#allocation7]  }
  0x15   :  { %s22_s16 = sshll.u32 %s1665_s15, 4  ;;  %s45_s18 = sshll.u32 %s1666_s17, 4  ;;  %s23_s16 = int_to_ptr.vmem [resolvable:$true] %s22_s16  ;;  %s46_s18 = int_to_ptr.vmem [resolvable:$true] %s45_s18 }
  0x16   :  { %s1566_s21 = scalar_lea.hbm %s1783_s0, 896 }
  0x17   :  { %p1567_p8 = scmp.ne.s32.totalorder %s1783_s0, %s1566_s21  ;;  %p1570_p9 = scmp.lt.u32.totalorder %s1566_s21, %s1783_s0 }
  0x19   :  { %p1572_p10 = pnand %p1570_p9, %p1567_p8 }
  0x1b   :  { %1575 = shalt.err (!%p1572_p10)
}
  0x1c   :  { %s1576_s1 = scalar_lea.vmem %s23_s16, 896  ;;  %p1581_p12 = scmp.lt.s32.totalorder %s23_s16, %s23_s16 }
  0x1d   :  { %p1577_p11 = scmp.ne.s32.totalorder %s23_s16, %s1576_s1  ;;  %p1582_p13 = scmp.lt.s32.totalorder %s1576_s1, %s1576_s1 }
  0x1f   :  { %p1583_p0 = por %p1582_p13, %p1581_p12 }
  0x21   :  { %p1584_p1 = pnand %p1583_p0, %p1577_p11 }
  0x23   :  { %1587 = shalt.err (!%p1584_p1)
}
  0x24   :  { %25 = dma.hbm_to_vmem [thread:$0]  %s1783_s0, 896, %s23_s16, [#allocation3]  }
  0x25   :  { %s1588_s30 = scalar_lea.hbm %s1786_s3, 2048 }
  0x26   :  { %p1589_p2 = scmp.ne.s32.totalorder %s1786_s3, %s1588_s30  ;;  %p1592_p3 = scmp.lt.u32.totalorder %s1588_s30, %s1786_s3 }
  0x28   :  { %p1594_p4 = pnand %p1592_p3, %p1589_p2 }
  0x2a   :  { %1597 = shalt.err (!%p1594_p4)
}
  0x2b   :  { %s1598_s12 = scalar_lea.vmem %s46_s18, 2048  ;;  %p1603_p6 = scmp.lt.s32.totalorder %s46_s18, %s46_s18 }
  0x2c   :  { %p1599_p5 = scmp.ne.s32.totalorder %s46_s18, %s1598_s12  ;;  %p1604_p7 = scmp.lt.s32.totalorder %s1598_s12, %s1598_s12 }
  0x2e   :  { %p1605_p8 = por %p1604_p7, %p1603_p6 }
  0x30   :  { %p1606_p9 = pnand %p1605_p8, %p1599_p5 }
  0x32   :  { %1609 = shalt.err (!%p1606_p9)
}
  0x33   :  { %s1667_s0 = smov 64   ;;  %s1668_s13 = smov 4  }
  0x34   :  { %51 = dma.hbm_to_vmem [thread:$0]  %s1786_s3, 2048, %s46_s18, [#allocation6], %s1667_s0, %s1667_s0, %s1668_s13  }
  0x35   :  { %s1669_s16 = smov [#allocation8]   ;;  %s1610_s21 = scalar_lea.hbm %s1788_s5, 1024 }
  0x36   :  { %s59_s17 = sshll.u32 %s1669_s16, 4  ;;  %p1611_p10 = scmp.ne.s32.totalorder %s1788_s5, %s1610_s21  ;;  %s60_s17 = int_to_ptr.vmem [resolvable:$true] %s59_s17 }
  0x37   :  { %p1614_p11 = scmp.lt.u32.totalorder %s1610_s21, %s1788_s5 }
  0x39   :  { %p1616_p12 = pnand %p1614_p11, %p1611_p10 }
  0x3b   :  { %1619 = shalt.err (!%p1616_p12)
}
  0x3c   :  { %s1620_s1 = scalar_lea.vmem %s60_s17, 1024  ;;  %p1625_p0 = scmp.lt.s32.totalorder %s60_s17, %s60_s17 }
  0x3d   :  { %p1621_p13 = scmp.ne.s32.totalorder %s60_s17, %s1620_s1  ;;  %p1626_p1 = scmp.lt.s32.totalorder %s1620_s1, %s1620_s1 }
  0x3f   :  { %p1627_p2 = por %p1626_p1, %p1625_p0 }
  0x41   :  { %p1628_p3 = pnand %p1627_p2, %p1621_p13 }
  0x43   :  { %1631 = shalt.err (!%p1628_p3)
}
  0x44   :  { %65 = dma.hbm_to_vmem [thread:$0]  %s1788_s5, 1024, %s60_s17, [#allocation9], %s1667_s0, %s1667_s0, %s1668_s13  }
  0x45   :  { %1654 = dma.done.wait [#allocation3], 896  }
  0x46   :  { %1655 = vsyncadd [#allocation3], 4294966400 }
  0x47   :  { %1656 = dma.done.wait [#allocation6], 14592  }
  0x48   :  { %1657 = vsyncadd [#allocation6], 4294952704 }
  0x49   :  { %1658 = dma.done.wait [#allocation9], 1024  }
  0x4a   :  { %1659 = vsyncadd [#allocation9], 4294966272  ;;  %v1373_v0 = vld [vmem:[#allocation5 + $0x104] ss:$8 sps:$4 sm:$0xff]   ;;  %v1375_v1 = vld [vmem:[#allocation5 + $0x100] ss:$8 sps:$4 sm:$0xff]  }
  0x4b   :  { %740 = vmatprep.subr.bf16.mxu0 %v1373_v0  ;;  %v1376_v2 = vld [vmem:[#allocation5 + $0x114] ss:$8 sps:$4 sm:$0xff]   ;;  %v1378_v3 = vld [vmem:[#allocation5 + $0x110] ss:$8 sps:$4 sm:$0xff]   ;;  %v1379_v4 = vld [vmem:[#allocation5 + $0x124] ss:$8 sps:$4 sm:$0xff]  }
  0x4c   :  { %741 = vmatpush1.bf16.msra.mxu0 %v1375_v1  ;;  %v1381_v5 = vld [vmem:[#allocation5 + $0x120] ss:$8 sps:$4 sm:$0xff]   ;;  %v1382_v6 = vld [vmem:[#allocation5 + $0x134] ss:$8 sps:$4 sm:$0xff]   ;;  %v1384_v7 = vld [vmem:[#allocation5 + $0x130] ss:$8 sps:$4 sm:$0xff]  }
  0x4d   :  { %742 = vmatprep.subr.bf16.mxu0 %v1376_v2  ;;  %v1385_v8 = vld [vmem:[#allocation5 + $0x144] ss:$8 sps:$4 sm:$0xff]   ;;  %v1387_v9 = vld [vmem:[#allocation5 + $0x140] ss:$8 sps:$4 sm:$0xff]   ;;  %v1388_v10 = vld [vmem:[#allocation5 + $0x154] ss:$8 sps:$4 sm:$0xff]  }
  0x4e   :  { %v1390_v11 = vld [vmem:[#allocation5 + $0x150] ss:$8 sps:$4 sm:$0xff]   ;;  %v1391_v12 = vld [vmem:[#allocation5 + $0x164] ss:$8 sps:$4 sm:$0xff]   ;;  %v1393_v15 = vld [vmem:[#allocation5 + $0x160] ss:$8 sps:$4 sm:$0xff]  }
  0x4f   :  { %v84_v13 = vld [vmem:[#allocation2 + $0x18] sm:$0xff]  ;;  %v1394_v16 = vld [vmem:[#allocation5 + $0x174] ss:$8 sps:$4 sm:$0xff]   ;;  %v1396_v18 = vld [vmem:[#allocation5 + $0x170] ss:$8 sps:$4 sm:$0xff]   ;;  %vm695_vm0 = vcmask 130048  }
  0x50   :  { %743 = vmatpush1.bf16.msra.mxu0 %v1378_v3  ;;  %v91_v14 = vpack.c.bf16 %v84_v13, %v84_v13  ;;  %v1427_v17 = vld [vmem:[#allocation5 + $0x4] ss:$8 sps:$4 sm:$0xff]   ;;  %v1432_v20 = vld [vmem:[#allocation5] ss:$8 sps:$4 sm:$0xff]   ;;  %v1433_v21 = vld [vmem:[#allocation5 + $0x14] ss:$8 sps:$4 sm:$0xff]  }
  0x51   :  { %744 = vmatprep.subr.bf16.mxu0 %v1379_v4  ;;  %v1397_v19 = vld [vmem:[#allocation5 + $0x184] ss:$8 sps:$4 sm:$0xff]   ;;  %699 = vmatprep.subr.bf16.mxu1 %v1427_v17  ;;  %v1438_v22 = vld [vmem:[#allocation5 + $0x10] ss:$8 sps:$4 sm:$0xff]   ;;  %v1399_v24 = vld [vmem:[#allocation5 + $0x180] ss:$8 sps:$4 sm:$0xff]  }
  0x52   :  { %772 = vmatprep.mubr.bf16.mxu0 %v91_v14  ;;  %700 = vmatpush1.bf16.msra.mxu1 %v1432_v20  ;;  %v1439_v23 = vld [vmem:[#allocation5 + $0x24] ss:$8 sps:$4 sm:$0xff]   ;;  %v1400_v25 = vld [vmem:[#allocation5 + $0x194] ss:$8 sps:$4 sm:$0xff]   ;;  %v1444_v26 = vld [vmem:[#allocation5 + $0x20] ss:$8 sps:$4 sm:$0xff]  }
  0x53   :  { %701 = vmatprep.subr.bf16.mxu1 %v1433_v21  ;;  %v1445_v27 = vld [vmem:[#allocation5 + $0x34] ss:$8 sps:$4 sm:$0xff]   ;;  %v1402_v28 = vld [vmem:[#allocation5 + $0x190] ss:$8 sps:$4 sm:$0xff]   ;;  %v1403_v29 = vld [vmem:[#allocation5 + $0x1a4] ss:$8 sps:$4 sm:$0xff]  }
  0x54   :  { %745 = vmatpush1.bf16.msra.mxu0 %v1381_v5  ;;  %v1450_v30 = vld [vmem:[#allocation5 + $0x30] ss:$8 sps:$4 sm:$0xff]   ;;  %v1451_v31 = vld [vmem:[#allocation5 + $0x44] ss:$8 sps:$4 sm:$0xff]   ;;  %v1405_v32 = vld [vmem:[#allocation5 + $0x1a0] ss:$8 sps:$4 sm:$0xff]  }
  0x55   :  { %746 = vmatprep.subr.bf16.mxu0 %v1382_v6  ;;  %v1406_v33 = vld [vmem:[#allocation5 + $0x1b4] ss:$8 sps:$4 sm:$0xff]   ;;  %v1456_v34 = vld [vmem:[#allocation5 + $0x40] ss:$8 sps:$4 sm:$0xff]   ;;  %v1408_v36 = vld [vmem:[#allocation5 + $0x1b0] ss:$8 sps:$4 sm:$0xff]  }
  0x56   :  { %702 = vmatpush1.bf16.msra.mxu1 %v1438_v22  ;;  %v1457_v35 = vld [vmem:[#allocation5 + $0x54] ss:$8 sps:$4 sm:$0xff]   ;;  %v1409_v37 = vld [vmem:[#allocation5 + $0x1c4] ss:$8 sps:$4 sm:$0xff]   ;;  %v1462_v38 = vld [vmem:[#allocation5 + $0x50] ss:$8 sps:$4 sm:$0xff]  }
  0x57   :  { %703 = vmatprep.subr.bf16.mxu1 %v1439_v23  ;;  %v1463_v39 = vld [vmem:[#allocation5 + $0x64] ss:$8 sps:$4 sm:$0xff]   ;;  %v1411_v40 = vld [vmem:[#allocation5 + $0x1c0] ss:$8 sps:$4 sm:$0xff]   ;;  %v1412_v41 = vld [vmem:[#allocation5 + $0x1d4] ss:$8 sps:$4 sm:$0xff]  }
  0x58   :  { %747 = vmatpush1.bf16.msra.mxu0 %v1384_v7  ;;  %v1468_v42 = vld [vmem:[#allocation5 + $0x60] ss:$8 sps:$4 sm:$0xff]   ;;  %v1469_v43 = vld [vmem:[#allocation5 + $0x74] ss:$8 sps:$4 sm:$0xff]   ;;  %v1414_v44 = vld [vmem:[#allocation5 + $0x1d0] ss:$8 sps:$4 sm:$0xff]  }
  0x59   :  { %748 = vmatprep.subr.bf16.mxu0 %v1385_v8  ;;  %v1415_v45 = vld [vmem:[#allocation5 + $0x1e4] ss:$8 sps:$4 sm:$0xff]   ;;  %v1474_v46 = vld [vmem:[#allocation5 + $0x70] ss:$8 sps:$4 sm:$0xff]   ;;  %v1417_v48 = vld [vmem:[#allocation5 + $0x1e0] ss:$8 sps:$4 sm:$0xff]  }
  0x5a   :  { %704 = vmatpush1.bf16.msra.mxu1 %v1444_v26  ;;  %v1475_v47 = vld [vmem:[#allocation5 + $0x84] ss:$8 sps:$4 sm:$0xff]   ;;  %v1418_v49 = vld [vmem:[#allocation5 + $0x1f4] ss:$8 sps:$4 sm:$0xff]   ;;  %v1480_v50 = vld [vmem:[#allocation5 + $0x80] ss:$8 sps:$4 sm:$0xff]  }
  0x5b   :  { %705 = vmatprep.subr.bf16.mxu1 %v1445_v27  ;;  %v1420_v51 = vld [vmem:[#allocation5 + $0x1f0] ss:$8 sps:$4 sm:$0xff]   ;;  %v1481_v52 = vld [vmem:[#allocation5 + $0x94] ss:$8 sps:$4 sm:$0xff]   ;;  %v1423_v54 = vld [vmem:[#allocation5 + $0x204] ss:$8 sps:$4 sm:$0xff]  }
  0x5c   :  { %749 = vmatpush1.bf16.msra.mxu0 %v1387_v9  ;;  %v83_v53 = vld [vmem:[#allocation2 + $0x10] sm:$0xff]  ;;  %v1487_v56 = vld [vmem:[#allocation5 + $0xa4] ss:$8 sps:$4 sm:$0xff]   ;;  %v86_v58 = vld [vmem:[#allocation2 + $0x28] sm:$0xff]  ;;  %vm1672_vm1 = vmmov 0   ;;  %s1673_s30 = smov [#allocation10]  }
  0x5d   :  { %750 = vmatprep.subr.bf16.mxu0 %v1388_v10  ;;  %v1486_v55 = vld [vmem:[#allocation5 + $0x90] ss:$8 sps:$4 sm:$0xff]   ;;  %v90_v57 = vpack.c.bf16 %v83_v53, %v83_v53  ;;  %v1421_v59 = vld [vmem:[#allocation5 + $0x200] ss:$8 sps:$4 sm:$0xff]   ;;  %v93_v60 = vpack.c.bf16 %v86_v58, %v86_v58  ;;  %v1426_v61 = vld [vmem:[#allocation5 + $0x214] ss:$8 sps:$4 sm:$0xff]  }
  0x5e   :  { %706 = vmatpush1.bf16.msra.mxu1 %v1450_v30  ;;  %v1492_v62 = vld [vmem:[#allocation5 + $0xa0] ss:$8 sps:$4 sm:$0xff]   ;;  %v1493_v63 = vld [vmem:[#allocation5 + $0xb4] ss:$8 sps:$4 sm:$0xff]   ;;  %v1424_v1 = vld [vmem:[#allocation5 + $0x210] ss:$8 sps:$4 sm:$0xff]  }
  0x5f   :  { %707 = vmatprep.subr.bf16.mxu1 %v1451_v31  ;;  %v82_v0 = vld [vmem:[#allocation2 + $0x8] sm:$0xff]  ;;  %v1431_v3 = vld [vmem:[#allocation5 + $0x224] ss:$8 sps:$4 sm:$0xff]   ;;  %v1429_v6 = vld [vmem:[#allocation5 + $0x220] ss:$8 sps:$4 sm:$0xff]   ;;  %s1162_s8 = sshll.u32 %s1673_s30, 4  ;;  %s1163_s8 = int_to_ptr.vmem [resolvable:$true] %s1162_s8 }
  0x60   :  { %751 = vmatpush1.bf16.msra.mxu0 %v1390_v11  ;;  %v89_v2 = vpack.c.bf16 %v82_v0, %v82_v0  ;;  %v1498_v4 = vld [vmem:[#allocation5 + $0xb0] ss:$8 sps:$4 sm:$0xff]   ;;  %v1499_v5 = vld [vmem:[#allocation5 + $0xc4] ss:$8 sps:$4 sm:$0xff]   ;;  %v1437_v7 = vld [vmem:[#allocation5 + $0x234] ss:$8 sps:$4 sm:$0xff]   ;;  %p1637_p5 = scmp.lt.s32.totalorder %s1163_s8, %s1163_s8 }
  0x61   :  { %752 = vmatprep.subr.bf16.mxu0 %v1391_v12  ;;  %v1504_v8 = vld [vmem:[#allocation5 + $0xc0] ss:$8 sps:$4 sm:$0xff]   ;;  %v1505_v9 = vld [vmem:[#allocation5 + $0xd4] ss:$8 sps:$4 sm:$0xff]   ;;  %v1435_v10 = vld [vmem:[#allocation5 + $0x230] ss:$8 sps:$4 sm:$0xff]  }
  0x62   :  { %708 = vmatpush1.bf16.msra.mxu1 %v1456_v34  ;;  %731 = vmatprep.mubr.bf16.mxu1 %v89_v2  ;;  %v1443_v11 = vld [vmem:[#allocation5 + $0x244] ss:$8 sps:$4 sm:$0xff]   ;;  %v1441_v12 = vld [vmem:[#allocation5 + $0x240] ss:$8 sps:$4 sm:$0xff]   ;;  %v1510_v13 = vld [vmem:[#allocation5 + $0xd0] ss:$8 sps:$4 sm:$0xff]  }
  0x63   :  { %709 = vmatprep.subr.bf16.mxu1 %v1457_v35  ;;  %v1511_v14 = vld [vmem:[#allocation5 + $0xe4] ss:$8 sps:$4 sm:$0xff]   ;;  %v1517_v17 = vld [vmem:[#allocation5 + $0xf4] ss:$8 sps:$4 sm:$0xff]   ;;  %v1519_v20 = vld [vmem:[#allocation5 + $0xf0] ss:$8 sps:$4 sm:$0xff]  }
  0x64   :  { %753 = vmatpush1.bf16.msra.mxu0 %v1393_v15  ;;  %v1449_v15 = vld [vmem:[#allocation5 + $0x254] ss:$8 sps:$4 sm:$0xff]   ;;  %v81_v21 = vld [vmem:[#allocation2] sm:$0xff]  ;;  %v1524_v31 = vld [vmem:[#allocation7 + $0x50] sm:$0xff]  }
  0x65   :  { %754 = vmatprep.subr.bf16.mxu0 %v1394_v16  ;;  %v1516_v16 = vld [vmem:[#allocation5 + $0xe0] ss:$8 sps:$4 sm:$0xff]   ;;  %v1520_v22 = vld [vmem:[#allocation7 + $0x40] sm:$0xff]   ;;  %v1522_v27 = vld [vmem:[#allocation7 + $0x48] sm:$0xff]  }
  0x66   :  { %710 = vmatpush1.bf16.msra.mxu1 %v1462_v38  ;;  %v1453_v23 = vld [vmem:[#allocation5 + $0x260] ss:$8 sps:$4 sm:$0xff]   ;;  %v1521_v26 = vld [vmem:[#allocation7] sm:$0xff]   ;;  %v1523_v30 = vld [vmem:[#allocation7 + $0x8] sm:$0xff]  }
  0x67   :  { %711 = vmatprep.subr.bf16.mxu1 %v1463_v39  ;;  %v1525_v34 = vld [vmem:[#allocation7 + $0x10] sm:$0xff]   ;;  %v1526_v35 = vld [vmem:[#allocation7 + $0x58] sm:$0xff]   ;;  %v1528_v39 = vld [vmem:[#allocation7 + $0x60] sm:$0xff]  }
  0x68   :  { %755 = vmatpush1.bf16.msra.mxu0 %v1396_v18  ;;  %v1447_v18 = vld [vmem:[#allocation5 + $0x250] ss:$8 sps:$4 sm:$0xff]   ;;  %v1527_v38 = vld [vmem:[#allocation7 + $0x18] sm:$0xff]  }
  0x69   :  { %756 = vmatprep.subr.bf16.mxu0 %v1397_v19  ;;  %v1455_v19 = vld [vmem:[#allocation5 + $0x264] ss:$8 sps:$4 sm:$0xff]  }
  0x6a   :  { %712 = vmatpush1.bf16.msra.mxu1 %v1468_v42  ;;  %v1529_v42 = vld [vmem:[#allocation7 + $0x20] sm:$0xff]   ;;  %v1515_v53 = vld [vmem:[#allocation5 + $0x304] ss:$8 sps:$4 sm:$0xff]  }
  0x6b   :  { %713 = vmatprep.subr.bf16.mxu1 %v1469_v43  ;;  %v1483_v43 = vld [vmem:[#allocation5 + $0x2b0] ss:$8 sps:$4 sm:$0xff]   ;;  %v1535_v0 = vld [vmem:[#allocation7 + $0x38] sm:$0xff]  }
  0x6c   :  { %757 = vmatpush1.bf16.msra.mxu0 %v1399_v24  ;;  %v1461_v24 = vld [vmem:[#allocation5 + $0x274] ss:$8 sps:$4 sm:$0xff]  }
  0x6d   :  { %758 = vmatprep.subr.bf16.mxu0 %v1400_v25  ;;  %v88_v25 = vpack.c.bf16 %v81_v21, %v81_v21 }
  0x6e   :  { %714 = vmatpush1.bf16.msra.mxu1 %v1474_v46  ;;  %v1497_v46 = vld [vmem:[#allocation5 + $0x2d4] ss:$8 sps:$4 sm:$0xff]  }
  0x6f   :  { %715 = vmatprep.subr.bf16.mxu1 %v1475_v47  ;;  %v1495_v47 = vld [vmem:[#allocation5 + $0x2d0] ss:$8 sps:$4 sm:$0xff]  }
  0x70   :  { %759 = vmatpush1.bf16.msra.mxu0 %v1402_v28  ;;  %v1459_v28 = vld [vmem:[#allocation5 + $0x270] ss:$8 sps:$4 sm:$0xff]  }
  0x71   :  { %760 = vmatprep.subr.bf16.mxu0 %v1403_v29  ;;  %v1467_v29 = vld [vmem:[#allocation5 + $0x284] ss:$8 sps:$4 sm:$0xff]  }
  0x72   :  { %716 = vmatpush1.bf16.msra.mxu1 %v1480_v50  ;;  %v1509_v50 = vld [vmem:[#allocation5 + $0x2f4] ss:$8 sps:$4 sm:$0xff]  }
  0x73   :  { %717 = vmatprep.subr.bf16.mxu1 %v1481_v52  ;;  %v85_v52 = vld [vmem:[#allocation2 + $0x20] sm:$0xff] }
  0x74   :  { %761 = vmatpush1.bf16.msra.mxu0 %v1405_v32  ;;  %v1465_v32 = vld [vmem:[#allocation5 + $0x280] ss:$8 sps:$4 sm:$0xff]  }
  0x75   :  { %762 = vmatprep.subr.bf16.mxu0 %v1406_v33  ;;  %v1473_v33 = vld [vmem:[#allocation5 + $0x294] ss:$8 sps:$4 sm:$0xff]  }
  0x76   :  { %718 = vmatpush1.bf16.msra.mxu1 %v1486_v55  ;;  %v1513_v55 = vld [vmem:[#allocation5 + $0x300] ss:$8 sps:$4 sm:$0xff]  }
  0x77   :  { %719 = vmatprep.subr.bf16.mxu1 %v1487_v56  ;;  %v1670_v56 = vmov 0  }
  0x78   :  { %763 = vmatpush1.bf16.msra.mxu0 %v1408_v36  ;;  %v1471_v36 = vld [vmem:[#allocation5 + $0x290] ss:$8 sps:$4 sm:$0xff]  }
  0x79   :  { %764 = vmatprep.subr.bf16.mxu0 %v1409_v37  ;;  %v1479_v37 = vld [vmem:[#allocation5 + $0x2a4] ss:$8 sps:$4 sm:$0xff]  }
  0x7a   :  { %720 = vmatpush1.bf16.msra.mxu1 %v1492_v62  ;;  %v1533_v62 = vld [vmem:[#allocation7 + $0x30] sm:$0xff]  }
  0x7b   :  { %721 = vmatprep.subr.bf16.mxu1 %v1493_v63  ;;  %v1534_v63 = vld [vmem:[#allocation7 + $0x78] sm:$0xff]  }
  0x7c   :  { %765 = vmatpush1.bf16.msra.mxu0 %v1411_v40  ;;  %v1477_v40 = vld [vmem:[#allocation5 + $0x2a0] ss:$8 sps:$4 sm:$0xff]  }
  0x7d   :  { %766 = vmatprep.subr.bf16.mxu0 %v1412_v41  ;;  %v1485_v41 = vld [vmem:[#allocation5 + $0x2b4] ss:$8 sps:$4 sm:$0xff]  }
  0x7e   :  { %722 = vmatpush1.bf16.msra.mxu1 %v1498_v4 }
  0x7f   :  { %723 = vmatprep.subr.bf16.mxu1 %v1499_v5 }
  0x80   :  { %767 = vmatpush1.bf16.msra.mxu0 %v1414_v44  ;;  %v1491_v44 = vld [vmem:[#allocation5 + $0x2c4] ss:$8 sps:$4 sm:$0xff]  }
  0x81   :  { %768 = vmatprep.subr.bf16.mxu0 %v1415_v45  ;;  %v1489_v45 = vld [vmem:[#allocation5 + $0x2c0] ss:$8 sps:$4 sm:$0xff]  }
  0x82   :  { %724 = vmatpush1.bf16.msra.mxu1 %v1504_v8 }
  0x83   :  { %725 = vmatprep.subr.bf16.mxu1 %v1505_v9  ;;  %v193_v9 = vld [vmem:[%s1785_s2] sm:$0x3] }
  0x84   :  { %769 = vmatpush1.bf16.msra.mxu0 %v1417_v48  ;;  %v1503_v48 = vld [vmem:[#allocation5 + $0x2e4] ss:$8 sps:$4 sm:$0xff]  }
  0x85   :  { %770 = vmatprep.subr.bf16.mxu0 %v1418_v49  ;;  %v1501_v49 = vld [vmem:[#allocation5 + $0x2e0] ss:$8 sps:$4 sm:$0xff]  }
  0x86   :  { %726 = vmatpush1.bf16.msra.mxu1 %v1510_v13 }
  0x87   :  { %727 = vmatprep.subr.bf16.mxu1 %v1511_v14 }
  0x88   :  { %771 = vmatpush1.bf16.msra.mxu0 %v1420_v51  ;;  %v1507_v51 = vld [vmem:[#allocation5 + $0x2f0] ss:$8 sps:$4 sm:$0xff]  }
  0x89   :  { %781 = vmatprep.subr.bf16.mxu0 %v1423_v54  ;;  %v92_v54 = vpack.c.bf16 %v85_v52, %v85_v52 }
  0x8a   :  { %728 = vmatpush1.bf16.msra.mxu1 %v1516_v16 }
  0x8b   :  { %773 = vmatmul.mubr.bf16.vlgmr.msra.gmra.mrb[0].mxu0 %v90_v57  ;;  %729 = vmatprep.subr.bf16.mxu1 %v1517_v17  ;;  %v87_v57 = vld [vmem:[#allocation2 + $0x30] sm:$0xff] }
  0x8c   :  { %782 = vmatpush1.bf16.msra.mxu0 %v1421_v59  ;;  %813 = vmatprep.mubr.bf16.mxu0 %v93_v60  ;;  %v94_v58 = vpack.c.bf16 %v87_v57, %v87_v57  ;;  %v1530_v59 = vld [vmem:[#allocation7 + $0x68] sm:$0xff]  }
  0x8d   :  { %783 = vmatprep.subr.bf16.mxu0 %v1426_v61  ;;  %v1531_v60 = vld [vmem:[#allocation7 + $0x28] sm:$0xff]   ;;  %v1532_v61 = vld [vmem:[#allocation7 + $0x70] sm:$0xff]  }
  0x8e   :  { %730 = vmatpush1.bf16.msra.mxu1 %v1519_v20 }
  0x8f   :  { %1298 = vmatprep.subr.bf16.mxu1 %v1520_v22 }
  0x90   :  { %784 = vmatpush1.bf16.msra.mxu0 %v1424_v1  ;;  %v1671_v1 = vmov 0.0  }
  0x91   :  { %785 = vmatprep.subr.bf16.mxu0 %v1431_v3  ;;  %732 = vmatmul.mubr.bf16.vlgmr.msra.gmra.mrb[0].mxu1 %v88_v25 }
  0x92   :  { %1299 = vmatpush3.bf16.msra.mxu1 %v1521_v26  ;;  %v1537_v26 = vld [vmem:[#allocation8 + $0x8] sm:$0xff]  }
  0x93   :  { %1300 = vmatprep.subr.bf16.mxu1 %v1522_v27  ;;  %v1538_v27 = vld [vmem:[#allocation8 + $0x10] sm:$0xff]  }
  0x94   :  { %786 = vmatpush1.bf16.msra.mxu0 %v1429_v6  ;;  %v195_v6 = vlaneseq }
  0x95   :  { %787 = vmatprep.subr.bf16.mxu0 %v1437_v7 }
  0x96   :  { %1301 = vmatpush3.bf16.msra.mxu1 %v1523_v30  ;;  %v196_v7 = vshrl.u32 %v195_v6, 7  ;;  %v1541_v30 = vld [vmem:[#allocation8 + $0x28] sm:$0xff]  }
  0x97   :  { %1302 = vmatprep.subr.bf16.mxu1 %v1524_v31  ;;  %v1542_v31 = vld [vmem:[#allocation8 + $0x30] sm:$0xff]  }
  0x98   :  { %788 = vmatpush1.bf16.msra.mxu0 %v1435_v10  ;;  %v197_v8 = vsub.s32 0, %v196_v7  ;;  %v201_v10 = vsub.s32 1, %v196_v7 }
  0x99   :  { %789 = vmatprep.subr.bf16.mxu0 %v1443_v11 }
  0x9a   :  { %1303 = vmatpush3.bf16.msra.mxu1 %v1525_v34  ;;  %v198_v11 = vrot.slane %v193_v9, %v197_v8  ;;  %v1272_v34 = vld [vmem:[%s1787_s4] ss:$0 sm:$0xff]  ;;  %s1632_s4 = scalar_lea.vmem %s1163_s8, 128 }
  0x9b   :  { %1304 = vmatprep.subr.bf16.mxu1 %v1526_v35  ;;  %p1633_p4 = scmp.ne.s32.totalorder %s1163_s8, %s1632_s4  ;;  %p1638_p6 = scmp.lt.s32.totalorder %s1632_s4, %s1632_s4 }
  0x9c   :  { %790 = vmatpush1.bf16.msra.mxu0 %v1441_v12  ;;  %v202_v12 = vrot.slane %v193_v9, %v201_v10 }
  0x9d   :  { %791 = vmatprep.subr.bf16.mxu0 %v1449_v15  ;;  %p1639_p7 = por %p1638_p6, %p1637_p5 }
  0x9e   :  { %1305 = vmatpush3.bf16.msra.mxu1 %v1527_v38 }
  0x9f   :  { %1306 = vmatprep.subr.bf16.mxu1 %v1528_v39  ;;  %p1640_p8 = pnand %p1639_p7, %p1633_p4 }
  0xa0   :  { %792 = vmatpush1.bf16.msra.mxu0 %v1447_v18 }
  0xa1   :  { %793 = vmatprep.subr.bf16.mxu0 %v1455_v19 }
  0xa2   :  { %1307 = vmatpush3.bf16.msra.mxu1 %v1529_v42  ;;  %v1289_v42 = vld [vmem:[%s1789_s6] ss:$0 sm:$0xff] }
  0xa3   :  { %1308 = vmatprep.subr.bf16.mxu1 %v1530_v59 }
  0xa4   :  { %794 = vmatpush1.bf16.msra.mxu0 %v1453_v23 }
  0xa5   :  { %795 = vmatprep.subr.bf16.mxu0 %v1461_v24  ;;  %v1536_v24 = vld [vmem:[#allocation8] sm:$0xff]  }
  0xa6   :  { %1309 = vmatpush3.bf16.msra.mxu1 %v1531_v60 }
  0xa7   :  { %1310 = vmatprep.subr.bf16.mxu1 %v1532_v61 }
  0xa8   :  { %796 = vmatpush1.bf16.msra.mxu0 %v1459_v28  ;;  %v1539_v28 = vld [vmem:[#allocation8 + $0x18] sm:$0xff]  }
  0xa9   :  { %797 = vmatprep.subr.bf16.mxu0 %v1467_v29  ;;  %v1540_v29 = vld [vmem:[#allocation8 + $0x20] sm:$0xff]  }
  0xaa   :  { %1311 = vmatpush3.bf16.msra.mxu1 %v1533_v62 }
  0xab   :  { %1312 = vmatprep.subr.bf16.mxu1 %v1534_v63 }
  0xac   :  { %798 = vmatpush1.bf16.msra.mxu0 %v1465_v32  ;;  %v1543_v32 = vld [vmem:[#allocation8 + $0x38] sm:$0xff]  }
  0xad   :  { %799 = vmatprep.subr.bf16.mxu0 %v1473_v33 }
  0xae   :  { %1313 = vmatpush3.bf16.msra.mxu1 %v1535_v0 }
  0xaf   :  { %1329 = vmatprep.subr.bf16.mxu1 %v1671_v1 }
  0xb0   :  { %800 = vmatpush1.bf16.msra.mxu0 %v1471_v36 }
  0xb1   :  { %801 = vmatprep.subr.bf16.mxu0 %v1479_v37 }
  0xb4   :  { %802 = vmatpush1.bf16.msra.mxu0 %v1477_v40 }
  0xb5   :  { %803 = vmatprep.subr.bf16.mxu0 %v1485_v41 }
  0xb8   :  { %804 = vmatpush1.bf16.msra.mxu0 %v1483_v43 }
  0xb9   :  { %805 = vmatprep.subr.bf16.mxu0 %v1491_v44 }
  0xbc   :  { %806 = vmatpush1.bf16.msra.mxu0 %v1489_v45 }
  0xbd   :  { %807 = vmatprep.subr.bf16.mxu0 %v1497_v46 }
  0xc0   :  { %808 = vmatpush1.bf16.msra.mxu0 %v1495_v47 }
  0xc1   :  { %809 = vmatprep.subr.bf16.mxu0 %v1503_v48 }
  0xc4   :  { %810 = vmatpush1.bf16.msra.mxu0 %v1501_v49 }
  0xc5   :  { %811 = vmatprep.subr.bf16.mxu0 %v1509_v50 }
  0xc8   :  { %812 = vmatpush1.bf16.msra.mxu0 %v1507_v51 }
  0xc9   :  { %822 = vmatprep.subr.bf16.mxu0 %v1515_v53 }
  0xcb   :  { %814 = vmatmul.mubr.bf16.vlgmr.msra.gmra.mrb[0].mxu0 %v92_v54 }
  0xcc   :  { %823 = vmatpush1.bf16.msra.mxu0 %v1513_v55  ;;  %854 = vmatprep.mubr.bf16.mxu0 %v1670_v56 }
  0xd7   :  { %1271 = vmatmul.mubr.msk.bf16.vlgmr.msra.gmra.mrb[0].mxu0 %vm695_vm0, %v94_v58 }
 0x164   :  { %v733_v2 = vpop.f32.mrb[0].mxu1 }
 0x165   :  { %v735_v3 = vpop.f32.mrb[1].mxu1  ;;  %v734_v13 = vadd.f32 %v733_v2, %v198_v11 }
 0x166   :  { %v737_v4 = vpop.f32.mrb[2].mxu1  ;;  %v736_v14 = vadd.f32 %v735_v3, %v202_v12 }
 0x167   :  { %v738_v5 = vpop.f32.mrb[3].mxu1 }
 0x1aa   :  { %v856_v15 = vpop.f32.mrb[0].mxu0 }
 0x1ab   :  { %v1350_v16 = vadd.f32 %v856_v15, %v734_v13  ;;  %v858_v17 = vpop.f32.mrb[1].mxu0 }
 0x1ac   :  { %v1352_v18 = vadd.f32 %v858_v17, %v736_v14  ;;  %v860_v19 = vpop.f32.mrb[2].mxu0 }
 0x1ad   :  { %v863_v20 = vmax.f32 %v1350_v16, 0.0  ;;  %v861_v21 = vpop.f32.mrb[3].mxu0 }
 0x1ae   :  { %v864_v22 = vmax.f32 %v1352_v18, 0.0 }
 0x1af   :  { %v865_v25 = vpack.c.bf16 %v863_v20, %v863_v20 }
 0x1b0   :  { %v866_v23 = vpack.c.bf16 %v864_v22, %v864_v22 }
 0x1b2   :  { %1034 = vmatprep.mubr.bf16.mxu1 %v866_v23 }
 0x1b3   :  { %1035 = vmatmul.mubr.bf16.vlgmr.msra.gmra.mrb[4].mxu1 %v865_v25 }
 0x1b4   :  { %1330 = vmatpush3.bf16.msra.mxu1 %v1536_v24  ;;  %1345 = vmatprep.mubr.msk.bf16.mxu1 %vm1672_vm1, %v1671_v1 }
 0x1b5   :  { %1331 = vmatprep.subr.bf16.mxu1 %v1671_v1 }
 0x1b8   :  { %1332 = vmatpush3.bf16.msra.mxu1 %v1537_v26 }
 0x1b9   :  { %1333 = vmatprep.subr.bf16.mxu1 %v1671_v1 }
 0x1bc   :  { %1334 = vmatpush3.bf16.msra.mxu1 %v1538_v27 }
 0x1bd   :  { %1335 = vmatprep.subr.bf16.mxu1 %v1671_v1 }
 0x1c0   :  { %1336 = vmatpush3.bf16.msra.mxu1 %v1539_v28 }
 0x1c1   :  { %1337 = vmatprep.subr.bf16.mxu1 %v1671_v1 }
 0x1c4   :  { %1338 = vmatpush3.bf16.msra.mxu1 %v1540_v29 }
 0x1c5   :  { %1339 = vmatprep.subr.bf16.mxu1 %v1671_v1 }
 0x1c8   :  { %1340 = vmatpush3.bf16.msra.mxu1 %v1541_v30 }
 0x1c9   :  { %1341 = vmatprep.subr.bf16.mxu1 %v1671_v1 }
 0x1cc   :  { %1342 = vmatpush3.bf16.msra.mxu1 %v1542_v31 }
 0x1cd   :  { %1343 = vmatprep.subr.bf16.mxu1 %v1671_v1 }
 0x1d0   :  { %1344 = vmatpush3.bf16.msra.mxu1 %v1543_v32 }
 0x286   :  { %v1314_v33 = vpop.f32.mrb[4].mxu1 }
 0x287   :  { %v1315_v35 = vpop.f32.mrb[5].mxu1 }
 0x288   :  { %v1316_v36 = vadd.f32 %v1315_v35, %v1314_v33  ;;  %v1317_v37 = vpop.f32.mrb[6].mxu1 }
 0x289   :  { %v1318_v38 = vpop.f32.mrb[7].mxu1 }
 0x28a   :  { %v1037_v39 = vadd.f32 %v1316_v36, %v1272_v34 }
 0x28c   :  { %v1042_v40 = vmax.f32 %v1037_v39, 0.0 }
 0x28e   :  { %v1043_v41 = vpack.c.bf16 %v1042_v40, %v1042_v40 }
 0x290   :  { %1346 = vmatmul.mubr.bf16.vlgmr.msra.gmra.mrb[8].mxu1 %v1043_v41 }
 0x363   :  { %v1149_v43 = vpop.f32.mrb[8].mxu1 }
 0x364   :  { %v1150_v44 = vadd.f32 %v1289_v42, %v1149_v43  ;;  %v1347_v45 = vpop.f32.mrb[9].mxu1 }
 0x365   :  { %v1152_v46 = vpop.f32.mrb[10].mxu1 }
 0x366   :  { %1155 = vst [vmem:[#allocation10] sm:$0xff] %v1150_v44  ;;  %v1348_v47 = vpop.f32.mrb[11].mxu1 }
 0x367   :  { %1643 = shalt.err (!%p1640_p8)
}
 0x368   :  { %s1644_s6 = scalar_lea.hbm %s1790_s7, 128 }
 0x369   :  { %p1645_p9 = scmp.ne.s32.totalorder %s1790_s7, %s1644_s6  ;;  %p1648_p10 = scmp.lt.u32.totalorder %s1644_s6, %s1790_s7 }
 0x36b   :  { %p1650_p11 = pnand %p1648_p10, %p1645_p9 }
 0x36d   :  { %1653 = shalt.err (!%p1650_p11)
}
 0x36e   :  { %1165 = dma.vmem_to_hbm [thread:$0]  %s1163_s8, 128, %s1790_s7, [#allocation4]  }
 0x36f   :  { %1660 = dma.done.wait [#allocation4], 128  }
 0x370   :  { %1661 = vsyncadd [#allocation4], 4294967168 }
 0x371   :  { %1169 = vsyncpa [#allocation3], 1 }
 0x372   :  { %1170 = vsyncpa [#allocation6], 1 }
 0x373   :  { %1171 = vsyncpa [#allocation9], 1 }
 0x374   :  { %1172 = vsyncpa [#allocation4], 1 }

</bundles_post_ra>
